<compile_context>
chip_gen: v5e
topology: v5e:2x2
jax: 0.10.0
libtpu: 0.0.40
codegen_flags: <defaults>
</compile_context>

<pallas_src>
import functools

import jax
import jax.numpy as jnp
from jax import lax
from jax.experimental import pallas as pl
from jax.experimental.pallas import tpu as pltpu


MM_DTYPE = jnp.bfloat16            # MXU operand dtype (f32 accumulation everywhere)
_VMEM_LIMIT = 32 * 1024 * 1024     # conservative: fits v5e/v6e/v7x scoped/physical VMEM


def _tile_size(dim, target):
    """Use `target` only when it evenly divides `dim`; otherwise use the whole dim.

    Keeps every BlockSpec either aligned (target is a multiple of 8/128) or equal to the
    full array dim, and avoids padded-garbage blocks feeding a K-reduction.
    """
    if dim <= target or dim % target != 0:
        return dim
    return target


# ----------------------------------------------------------------------------
# Tiled, pipelined matmul kernel (used for every nn.Linear).
# ----------------------------------------------------------------------------
def _matmul_kernel(x_ref, w_ref, o_ref, acc_ref):
    @pl.when(pl.program_id(2) == 0)
    def _():
        acc_ref[...] = jnp.zeros_like(acc_ref)

    acc_ref[...] += jnp.dot(x_ref[...].astype(MM_DTYPE),
                            w_ref[...].astype(MM_DTYPE),
                            preferred_element_type=jnp.float32)

    @pl.when(pl.program_id(2) == pl.num_programs(2) - 1)
    def _():
        o_ref[...] = acc_ref[...].astype(o_ref.dtype)


def linear(x, w, *, tm_target=256, tn_target=512, tk_target=512):
    M, K = x.shape
    K2, N = w.shape
    assert K == K2
    tm = _tile_size(M, tm_target)
    tn = _tile_size(N, tn_target)
    tk = _tile_size(K, tk_target)
    return pl.pallas_call(
        _matmul_kernel,
        out_shape=jax.ShapeDtypeStruct((M, N), jnp.float32),
        grid=(M // tm, N // tn, K // tk),
        in_specs=[
            pl.BlockSpec((tm, tk), lambda i, j, k: (i, k)),
            pl.BlockSpec((tk, tn), lambda i, j, k: (k, j)),
        ],
        out_specs=pl.BlockSpec((tm, tn), lambda i, j, k: (i, j)),
        scratch_shapes=[pltpu.VMEM((tm, tn), jnp.float32)],
        compiler_params=pltpu.CompilerParams(
            dimension_semantics=("parallel", "parallel", "arbitrary"),
            vmem_limit_bytes=_VMEM_LIMIT),
    )(x, w)


# ----------------------------------------------------------------------------
# Fused PK kernel: per product-key p (and per m-tile), compute
#   q_p   = x @ Wq_p                      (m, h*dk)
#   sim_h = q_p[:, h] @ keys_p[h]         (m, nk)   for each head (static unroll)
# and store the heads concatenated along lanes: (m, h*nk).
# ----------------------------------------------------------------------------
def _pk_query_sim_kernel(x_ref, wq_ref, keys_ref, o_ref, *, heads, dk):
    x = x_ref[...].astype(MM_DTYPE)                      # (tm, dim)
    w = wq_ref[...].astype(MM_DTYPE)                     # (dim, h*dk)
    q = jnp.dot(x, w, preferred_element_type=jnp.float32)  # (tm, h*dk)

    sims = []
    for h in range(heads):                               # static, small
        qh = q[:, h * dk:(h + 1) * dk].astype(MM_DTYPE)  # (tm, dk)
        kh = keys_ref[h].astype(MM_DTYPE)                # (dk, nk)
        sims.append(jnp.dot(qh, kh, preferred_element_type=jnp.float32))
    o_ref[...] = jnp.concatenate(sims, axis=-1)          # (tm, h*nk)


def pk_query_sim(xf, pk_wq, pk_keys):
    M, dim = xf.shape
    P, _, hdk = pk_wq.shape                              # (p, dim, h*dk)
    _, H, dk, nk = pk_keys.shape                         # (p, h, dk, nk)
    tm = _tile_size(M, 256)
    kern = functools.partial(_pk_query_sim_kernel, heads=H, dk=dk)
    return pl.pallas_call(
        kern,
        out_shape=jax.ShapeDtypeStruct((P, M, H * nk), jnp.float32),
        grid=(P, M // tm),
        in_specs=[
            pl.BlockSpec((tm, dim), lambda p, i: (i, 0)),
            pl.BlockSpec((None, dim, hdk), lambda p, i: (p, 0, 0)),
            pl.BlockSpec((None, H, dk, nk), lambda p, i: (p, 0, 0, 0)),
        ],
        out_specs=pl.BlockSpec((None, tm, H * nk), lambda p, i: (p, i, 0)),
        compiler_params=pltpu.CompilerParams(
            dimension_semantics=("parallel", "parallel"),
            vmem_limit_bytes=_VMEM_LIMIT),
    )(xf, pk_wq, pk_keys)


# ----------------------------------------------------------------------------
# EmbeddingBag('sum', per_sample_weights) kernel with score softmax folded in.
#   idx: (R, K) int32, sc: (R, K) raw scores, kv_table: (V, 2*dim) = [keys | values].
#   k_out[r], v_out[r] = sum_k softmax(sc[r])[k] * table[idx[r, k]]
# Implemented as a weighted one-hot (Rt, V) followed by ONE MXU matmul against the
# concatenated table; tiled over R for pipelining / bounded VMEM.
# ----------------------------------------------------------------------------
# TODO(synk): for production num_key_values (V ~ 1e6 * heads) the dense one-hot path must be
#             replaced by an HBM-resident table (memory_space=pl.ANY) + scalar-prefetch DMA
#             gather of only the topk rows per R-tile (O(R*topk*dim) work instead of O(R*V)).
def _embedding_bag_kernel(idx_ref, sc_ref, tab_ref, ko_ref, vo_ref, *, dim):
    idx = idx_ref[...]                                   # (Rt, K) int32
    sc = sc_ref[...]                                     # (Rt, K) f32
    m = jnp.max(sc, axis=-1, keepdims=True)
    e = jnp.exp(sc - m)
    w = e * pl.reciprocal(jnp.sum(e, axis=-1, keepdims=True), approx=True)

    Rt, K = idx.shape
    V = tab_ref.shape[0]
    vids = lax.broadcasted_iota(jnp.int32, (Rt, K, V), 2)
    hit = vids == idx[:, :, None]                        # single broadcast compare
    acc = jnp.sum(jnp.where(hit, w[:, :, None], 0.0), axis=1)   # (Rt, V)

    res = jnp.dot(acc.astype(MM_DTYPE),
                  tab_ref[...].astype(MM_DTYPE),
                  preferred_element_type=jnp.float32)    # (Rt, 2*dim)
    ko_ref[...] = res[:, :dim]
    vo_ref[...] = res[:, dim:]


def embedding_bag(idx, sc, kv_table, *, dim):
    R, K = idx.shape
    V, two_d = kv_table.shape
    assert two_d == 2 * dim
    rt = _tile_size(R, 512)
    kern = functools.partial(_embedding_bag_kernel, dim=dim)
    return pl.pallas_call(
        kern,
        out_shape=(jax.ShapeDtypeStruct((R, dim), jnp.float32),
                   jax.ShapeDtypeStruct((R, dim), jnp.float32)),
        grid=(R // rt,),
        in_specs=[
            pl.BlockSpec((rt, K), lambda i: (i, 0)),
            pl.BlockSpec((rt, K), lambda i: (i, 0)),
            pl.BlockSpec((V, two_d), lambda i: (0, 0)),
        ],
        out_specs=(
            pl.BlockSpec((rt, dim), lambda i: (i, 0)),
            pl.BlockSpec((rt, dim), lambda i: (i, 0)),
        ),
        compiler_params=pltpu.CompilerParams(
            dimension_semantics=("parallel",),
            vmem_limit_bytes=_VMEM_LIMIT),
    )(idx, sc, kv_table)


# ----------------------------------------------------------------------------
# Causal attention kernel, one batch per grid step, all heads inside.
#   q, k, v, out: (b, n, h*d) lane-dense (h*d = heads*dim; 128 at the test shapes).
# ----------------------------------------------------------------------------
# TODO(synk): for long sequences convert to an online-softmax (flash) form with a KV grid
#             axis instead of materializing the full (n, n) score matrix per head.
def _attention_kernel(q_ref, k_ref, v_ref, o_ref, *, heads):
    n, hd = q_ref.shape
    d = hd // heads

    ii = lax.broadcasted_iota(jnp.int32, (n, n), 0)
    jj = lax.broadcasted_iota(jnp.int32, (n, n), 1)
    causal = jj > ii

    outs = []
    for h in range(heads):                               # static unroll, small
        sl = slice(h * d, (h + 1) * d)
        qh = q_ref[:, sl].astype(MM_DTYPE)               # (n, d), q already scaled
        kh = k_ref[:, sl].astype(MM_DTYPE)
        vh = v_ref[:, sl].astype(MM_DTYPE)
        s = lax.dot_general(qh, kh, (((1,), (1,)), ((), ())),
                            preferred_element_type=jnp.float32)   # (n, n)
        s = jnp.where(causal, -1e30, s)                  # large finite mask value
        s = s - jnp.max(s, axis=-1, keepdims=True)
        p = jnp.exp(s)
        p = p * pl.reciprocal(jnp.sum(p, axis=-1, keepdims=True), approx=True)
        outs.append(jnp.dot(p.astype(MM_DTYPE), vh,
                            preferred_element_type=jnp.float32))  # (n, d)
    o_ref[...] = jnp.concatenate(outs, axis=-1).astype(o_ref.dtype)   # (n, h*d) lane-dense


def attention(q, k, v, *, heads):
    B, N, HD = q.shape
    kern = functools.partial(_attention_kernel, heads=heads)
    return pl.pallas_call(
        kern,
        out_shape=jax.ShapeDtypeStruct((B, N, HD), jnp.float32),
        grid=(B,),
        in_specs=[pl.BlockSpec((None, N, HD), lambda b: (b, 0, 0))] * 3,
        out_specs=pl.BlockSpec((None, N, HD), lambda b: (b, 0, 0)),
        compiler_params=pltpu.CompilerParams(
            dimension_semantics=("parallel",),
            vmem_limit_bytes=_VMEM_LIMIT),
    )(q, k, v)


# ----------------------------------------------------------------------------
# PK module (product keys): returns (raw_topk_scores, flat indices).
# Score softmax is folded into the embedding-bag kernel downstream.
# ----------------------------------------------------------------------------
def pk_forward(x, params, *, heads, num_keys, product_keys, topk, final_topk):
    b, n, dim = x.shape
    nk = params["pk_keys"].shape[-1]
    assert nk == num_keys

    xf = x.reshape(b * n, dim)
    # fused projection + per-head similarity, output (p, b*n, h*nk), columns ordered (h, nk)
    sim = pk_query_sim(xf, params["pk_wq"], params["pk_keys"])
    sim = sim.reshape(product_keys, b, n, heads, num_keys)          # free reshape

    scores, indices = lax.top_k(sim, topk)                          # (p, b, n, h, topk)

    # strides = num_keys ** arange(p); combine via outer add, '(i j)' flattening
    idx = indices[0]
    sc = scores[0]
    for pi in range(1, product_keys):
        rest_idx = indices[pi] * (num_keys ** pi)
        rest_sc = scores[pi]
        idx = (idx[..., :, None] + rest_idx[..., None, :]).reshape(*idx.shape[:-1], -1)
        sc = (sc[..., :, None] + rest_sc[..., None, :]).reshape(*sc.shape[:-1], -1)

    final_scores, pk_idx = lax.top_k(sc, final_topk)                # (b, n, h, final_topk)
    final_indices = jnp.take_along_axis(idx, pk_idx, axis=-1)
    return final_scores, final_indices


# ----------------------------------------------------------------------------
# PKAttention forward.
# ----------------------------------------------------------------------------
def pk_attention_forward(x, params, *, heads, num_key_values, product_keys,
                         pk_topk, final_topk):
    b, n, dim = x.shape
    num_keys = int(round(num_key_values ** 0.5))

    # pre_rmsnorm=False -> Identity norm.
    xf = x.reshape(b * n, dim)

    # to_queries: Linear(dim, dim*heads); q*dim**-0.5 is folded into params["wq"] at init.
    # Columns are ordered (h, d), i.e. already the 'b n (h d)' lane-dense layout.
    q = linear(xf, params["wq"])                                     # (b*n, heads*dim)

    # product-key index/score selection (scores kept pre-softmax; softmax in EB kernel)
    kv_scores_raw, indices = pk_forward(
        x, params, heads=heads, num_keys=num_keys, product_keys=product_keys,
        topk=pk_topk, final_topk=final_topk)

    # per-head offsets into the shared embedding tables
    offsets = jnp.arange(heads, dtype=jnp.int32) * num_key_values
    indices = (indices + offsets[None, None, :, None]).astype(jnp.int32)   # (b, n, h, k)

    R = b * n * heads
    idx_flat = indices.reshape(R, final_topk)
    sc_flat = kv_scores_raw.reshape(R, final_topk)

    k_eb, v_eb = embedding_bag(idx_flat, sc_flat, params["kv_table"], dim=dim)

    # (b*n*h, dim) -> (b, n, h*dim): rows are ordered (b, n, h), so this is a free,
    # contiguous reshape that matches q's (h, d) column ordering. No transposes.
    k = k_eb.reshape(b, n, heads * dim)
    v = v_eb.reshape(b, n, heads * dim)
    qb = q.reshape(b, n, heads * dim)

    out = attention(qb, k, v, heads=heads)                           # (b, n, h*dim) lane-dense

    # to_out: 'b h n d -> b n (h d)' is already the layout; just the final Linear.
    y = linear(out.reshape(b * n, heads * dim), params["w_out"]).reshape(b, n, dim)
    return y


# ----------------------------------------------------------------------------
# Deterministic parameter init (synthetic; kernel-friendly layouts).
#   wq       : (dim, dim*heads)          == PyTorch to_queries weight^T, q-scale folded in
#   pk_wq    : (p, dim, heads*dk)        == PyTorch PK to_queries weight^T split per product key
#   pk_keys  : (p, heads, dk, num_keys)  == PyTorch PK keys (p, nk, h, dk) permuted
#   kv_table : (num_key_values*heads, 2*dim), cols [:dim]=keys EB weight, [dim:]=values EB weight
#   w_out    : (dim*heads, dim)          == PyTorch to_out weight^T
# Note: PK's default heads == PKAttention's default heads (8), which the PyTorch forward
# implicitly requires; we keep them equal.
# ----------------------------------------------------------------------------
def init_params(key, *, dim, heads, num_key_values, product_keys, dim_key):
    num_keys = int(round(num_key_values ** 0.5))
    ks = jax.random.split(key, 6)
    wq = jax.random.normal(ks[0], (dim, dim * heads), jnp.float32) / (dim ** 0.5)
    pk_wq = jax.random.normal(ks[1], (product_keys, dim, heads * dim_key),
                              jnp.float32) / (dim ** 0.5)
    pk_keys = 0.02 * jax.random.normal(
        ks[2], (product_keys, heads, dim_key, num_keys), jnp.float32)
    keys_table = jax.random.normal(ks[3], (num_key_values * heads, dim), jnp.float32)
    values_table = jax.random.normal(ks[4], (num_key_values * heads, dim), jnp.float32)
    w_out = jax.random.normal(ks[5], (dim * heads, dim), jnp.float32) / ((dim * heads) ** 0.5)
    return {
        "wq": wq * (dim ** -0.5),                       # q-scale folded into the weight
        "pk_wq": pk_wq,
        "pk_keys": pk_keys,
        "kv_table": jnp.concatenate([keys_table, values_table], axis=1),
        "w_out": w_out,
    }


if __name__ == "__main__":
    b, n, dim = 2, 8, 16
    heads = 8                       # shared by PKAttention and PK (as in PyTorch defaults)
    num_key_values = 64             # must be a perfect square -> num_keys = 8
    key_value_pk_topk = 4           # final_topk; product_key_topk defaults to it
    product_keys = 2
    dim_key = dim // 2

    root = jax.random.PRNGKey(0)
    kx, kp = jax.random.split(root)
    x = jax.random.normal(kx, (b, n, dim), jnp.float32)
    params = init_params(kp, dim=dim, heads=heads, num_key_values=num_key_values,
                         product_keys=product_keys, dim_key=dim_key)

    y = pk_attention_forward(
        x, params, heads=heads, num_key_values=num_key_values,
        product_keys=product_keys, pk_topk=key_value_pk_topk,
        final_topk=key_value_pk_topk)
    jax.block_until_ready(y)
    assert y.shape == (b, n, dim)
    assert bool(jnp.all(jnp.isfinite(y)))
    print("KERNEL_OK")
</pallas_src>

<mosaic_0001>
module attributes {stable_mosaic.version = 11 : i64} {
  func.func @_matmul_kernel(%arg0: i32, %arg1: i32, %arg2: i32, %arg3: memref<16x16xf32, #tpu.memory_space<vmem>>, %arg4: memref<16x128xf32, #tpu.memory_space<vmem>>, %arg5: memref<16x128xf32, #tpu.memory_space<vmem>>, %arg6: memref<16x128xf32, #tpu.memory_space<vmem>>) attributes {dimension_semantics = [#tpu.dimension_semantics<parallel>, #tpu.dimension_semantics<parallel>, #tpu.dimension_semantics<arbitrary>], iteration_bounds = array<i64: 1, 1, 1>, scalar_prefetch = 0 : i64, scratch_operands = 1 : i64, tpu.core_type = #tpu.core_type<tc>, window_params = [{transform_indices = @transform_0, window_bounds = array<i64: 16, 16>}, {transform_indices = @transform_1, window_bounds = array<i64: 16, 128>}, {transform_indices = @transform_2, window_bounds = array<i64: 16, 128>}]} {
    %c0_i32 = arith.constant 0 : i32
    %0 = arith.cmpi eq, %arg2, %c0_i32 : i32
    %1 = arith.extui %0 : i1 to i32
    %c0_i32_0 = arith.constant 0 : i32
    %2 = arith.cmpi ne, %1, %c0_i32_0 : i32
    scf.if %2 {
      %cst_10 = arith.constant 0.000000e+00 : f32
      %14 = vector.broadcast %cst_10 : f32 to vector<16x128xf32>
      %c0_11 = arith.constant 0 : index
      %c0_12 = arith.constant 0 : index
      %15 = vector.load %arg6[%c0_11, %c0_12] : memref<16x128xf32, #tpu.memory_space<vmem>>, vector<16x128xf32>
      tpu.vector_store %arg6[%c0_11, %c0_12], %14 {strides = array<i32>} : memref<16x128xf32, #tpu.memory_space<vmem>>, vector<16x128xf32>,
    } else {
    }
    %c0 = arith.constant 0 : index
    %c0_1 = arith.constant 0 : index
    %3 = vector.load %arg6[%c0, %c0_1] : memref<16x128xf32, #tpu.memory_space<vmem>>, vector<16x128xf32>
    %c0_2 = arith.constant 0 : index
    %c0_3 = arith.constant 0 : index
    %4 = vector.load %arg3[%c0_2, %c0_3] : memref<16x16xf32, #tpu.memory_space<vmem>>, vector<16x16xf32>
    %5 = arith.truncf %4 : vector<16x16xf32> to vector<16x16xbf16>
    %c0_4 = arith.constant 0 : index
    %c0_5 = arith.constant 0 : index
    %6 = vector.load %arg4[%c0_4, %c0_5] : memref<16x128xf32, #tpu.memory_space<vmem>>, vector<16x128xf32>
    %7 = arith.truncf %6 : vector<16x128xf32> to vector<16x128xbf16>
    %cst = arith.constant dense<0.000000e+00> : vector<16x128xf32>
    %8 = tpu.matmul %5, %7, %cst {dimension_numbers = #tpu.dot_dimension_numbers<[1], [0], [0], [1], [0, 0, 1, 1], [], []>} : vector<16x16xbf16>, vector<16x128xbf16>, vector<16x128xf32> -> vector<16x128xf32>
    %9 = arith.addf %3, %8 : vector<16x128xf32>
    %c0_6 = arith.constant 0 : index
    %c0_7 = arith.constant 0 : index
    %10 = vector.load %arg6[%c0_6, %c0_7] : memref<16x128xf32, #tpu.memory_space<vmem>>, vector<16x128xf32>
    tpu.vector_store %arg6[%c0_6, %c0_7], %9 {strides = array<i32>} : memref<16x128xf32, #tpu.memory_space<vmem>>, vector<16x128xf32>,
    %c0_i32_8 = arith.constant 0 : i32
    %11 = arith.cmpi eq, %arg2, %c0_i32_8 : i32
    %12 = arith.extui %11 : i1 to i32
    %c0_i32_9 = arith.constant 0 : i32
    %13 = arith.cmpi ne, %12, %c0_i32_9 : i32
    scf.if %13 {
      %c0_10 = arith.constant 0 : index
      %c0_11 = arith.constant 0 : index
      %14 = vector.load %arg6[%c0_10, %c0_11] : memref<16x128xf32, #tpu.memory_space<vmem>>, vector<16x128xf32>
      %c0_12 = arith.constant 0 : index
      %c0_13 = arith.constant 0 : index
      %15 = vector.load %arg5[%c0_12, %c0_13] : memref<16x128xf32, #tpu.memory_space<vmem>>, vector<16x128xf32>
      tpu.vector_store %arg5[%c0_12, %c0_13], %14 {strides = array<i32>} : memref<16x128xf32, #tpu.memory_space<vmem>>, vector<16x128xf32>,
    } else {
    }
    return
  }
  func.func @transform_0(%arg0: i32, %arg1: i32, %arg2: i32) -> (i32, i32) {
    %c0_i32 = arith.constant 0 : i32
    return %arg0, %arg2 : i32, i32
  }
  func.func @transform_1(%arg0: i32, %arg1: i32, %arg2: i32) -> (i32, i32) {
    %c0_i32 = arith.constant 0 : i32
    return %arg2, %arg1 : i32, i32
  }
  func.func @transform_2(%arg0: i32, %arg1: i32, %arg2: i32) -> (i32, i32) {
    %c0_i32 = arith.constant 0 : i32
    return %arg0, %arg1 : i32, i32
  }
}

</mosaic_0001>

<bundles_post_ra>
// kernel: tpu_custom_call.1
= control target key start
LH: loop header
LB: loop body
LE: loop exit
PB: predicated region body
PF: predicated region fallthrough
CT: control target
= control target key end

     0   :  { %7 = vsyncpa [#allocation4], 0  ;;  %s230_s0 = inlined_call_operand.hbm [shape: f32[16,16], index: 0, kind: input, shape index: {}]   ;;  %s231_s1 = inlined_call_operand.hbm [shape: f32[16,128], index: 1, kind: input, shape index: {}]   ;;  %s232_s2 = inlined_call_operand.hbm [shape: f32[16,128], index: 2, kind: output, shape index: {}]  }
   0x1   :  { %8 = vsyncpa [#allocation7], 0 }
   0x2   :  { %9 = vsyncpa [#allocation5], 0  ;;  %s14_s11 = sshll.u32 %s230_s0, 4  ;;  %s192_s12 = smov [#allocation3]   ;;  %s15_s11 = int_to_ptr.hbm [resolvable:$true] %s14_s11 }
   0x3   :  { %s16_s13 = sshll.u32 %s192_s12, 4  ;;  %s27_s16 = sshll.u32 %s231_s1, 4  ;;  %s17_s13 = int_to_ptr.vmem [resolvable:$true] %s16_s13  ;;  %s28_s16 = int_to_ptr.hbm [resolvable:$true] %s27_s16 }
   0x4   :  { %s193_s17 = smov 128   ;;  %s194_s18 = smov 8  }
   0x5   :  { %22 = dma.hbm_to_vmem [thread:$0]  %s15_s11, 256, %s17_s13, [#allocation4], %s193_s17, %s193_s17, %s194_s18  }
   0x6   :  { %s195_s19 = smov [#allocation6]  }
   0x7   :  { %s29_s20 = sshll.u32 %s195_s19, 4  ;;  %s30_s20 = int_to_ptr.vmem [resolvable:$true] %s29_s20 }
   0x8   :  { %35 = dma.hbm_to_vmem [thread:$0]  %s28_s16, 256, %s30_s20, [#allocation7], %s193_s17, %s193_s17, %s194_s18  }
   0x9   :  { %186 = dma.done.wait [#allocation4], 256  }
   0xa   :  { %187 = vsyncadd [#allocation4], 4294967040 }
   0xb   :  { %188 = dma.done.wait [#allocation7], 256  }
   0xc   :  { %189 = vsyncadd [#allocation7], 4294967040  ;;  %v56_v0 = vld [vmem:[#allocation6] sm:$0xff]  ;;  %v57_v1 = vld [vmem:[#allocation6 + $0x8] sm:$0xff]  ;;  %vm59_vm0 = vcmask 130048   ;;  %s196_s0 = smov [#allocation8]  }
   0xd   :  { %v53_v2 = vld [vmem:[#allocation3] sm:$0xff]  ;;  %v58_v3 = vpack.c.bf16 %v57_v1, %v56_v0  ;;  %v54_v4 = vld [vmem:[#allocation3 + $0x8] sm:$0xff]  ;;  %s92_s1 = sshll.u32 %s196_s0, 4  ;;  %s94_s23 = sshll.u32 %s232_s2, 4  ;;  %s93_s1 = int_to_ptr.vmem [resolvable:$true] %s92_s1  ;;  %s95_s23 = int_to_ptr.hbm [resolvable:$true] %s94_s23 }
   0xe   :  { %v55_v5 = vpack.c.bf16 %v54_v4, %v53_v2 }
   0xf   :  { %70 = vmatpush.bf16.msra.mxu0 %v58_v3 }
  0x12   :  { %108 = vmatmul.msk.bf16.vlgmr.msra.gmra.mxu0 %vm59_vm0, %v55_v5 }
  0x8f   :  { %v72_v6 = vpop.f32.mrf.mxu0 }
  0x90   :  { %86 = vst [vmem:[#allocation8] sm:$0xff] %v72_v6 }
  0x97   :  { %v74_v7 = vpop.f32.mrf.mxu0 }
  0x98   :  { %87 = vst [vmem:[#allocation8 + $0x8] sm:$0xff] %v74_v7 }
  0x99   :  { %100 = dma.vmem_to_hbm [thread:$0]  %s93_s1, 256, %s95_s23, [#allocation5], %s193_s17, %s193_s17, %s194_s18  }
  0x9a   :  { %190 = dma.done.wait [#allocation5], 256  }
  0x9b   :  { %191 = vsyncadd [#allocation5], 4294967040 }
  0x9c   :  { %105 = vsyncpa [#allocation4], 1 }
  0x9d   :  { %106 = vsyncpa [#allocation7], 1 }
  0x9e   :  { %107 = vsyncpa [#allocation5], 1 }

</bundles_post_ra>
